<compile_context>
chip_gen: v5e
topology: v5e:2x2
jax: 0.10.0
libtpu: 0.0.40
codegen_flags: <defaults>
</compile_context>

<pallas_src>
import functools

import jax
import jax.numpy as jnp
from jax.experimental import pallas as pl
from jax.experimental.pallas import tpu as pltpu

LANE = 128


def _round_up(n, m):
    return ((n + m - 1) // m) * m


def _pad2(a, rows, cols):
    return jnp.pad(a, ((0, rows - a.shape[0]), (0, cols - a.shape[1])))


def _mlp_kernel(x_ref, w1_ref, b1_ref, w2_ref, b2_ref, w3_ref, b3_ref, o_ref):
    # fc1 + ReLU  (bf16 operands, f32 accumulation on the MXU)
    h1 = jnp.dot(x_ref[...], w1_ref[...], preferred_element_type=jnp.float32)
    h1 = jnp.maximum(h1 + b1_ref[...], 0.0)
    # fc2 + ReLU
    h2 = jnp.dot(h1.astype(jnp.bfloat16), w2_ref[...],
                 preferred_element_type=jnp.float32)
    h2 = jnp.maximum(h2 + b2_ref[...], 0.0)
    # cls_head + sigmoid (fused epilogue; VPU/EUP slack makes this free filler)
    logits = jnp.dot(h2.astype(jnp.bfloat16), w3_ref[...],
                     preferred_element_type=jnp.float32)
    o_ref[...] = jax.nn.sigmoid(logits + b3_ref[...])


@functools.partial(jax.jit, static_argnames=("tm",))
def protein_classifier_forward(x, params, tm=512):
    """x: [B, D_in]. params: w1 [D_in,120], b1 [1,120], w2 [120,84], b2 [1,84],
    w3 [84,10], b3 [1,10] (weights transposed vs. PyTorch). Returns [B,10] f32."""
    w1, b1 = params["w1"], params["b1"]
    w2, b2 = params["w2"], params["b2"]
    w3, b3 = params["w3"], params["b3"]

    B, d_in = x.shape
    h1_d, h2_d, d_out = w1.shape[1], w2.shape[1], w3.shape[1]
    assert d_in % LANE == 0, "input feature dim must be a lane multiple"

    # Lane-dense padded widths (unmasked vregs / full MXU columns).
    h1_p = _round_up(h1_d, LANE)
    h2_p = _round_up(h2_d, LANE)
    out_p = _round_up(d_out, LANE)

    # Batch tiling: TM rows per grid step; weights resident, x double-buffered.
    tm_eff = min(tm, _round_up(B, 8))
    b_pad = _round_up(B, tm_eff)

    # bf16 operands (halve dominant DMA bytes: x and W1), biases stay f32.
    xp = jnp.pad(x, ((0, b_pad - B), (0, 0))).astype(jnp.bfloat16)
    w1p = _pad2(w1, d_in, h1_p).astype(jnp.bfloat16)
    w2p = _pad2(w2, h1_p, h2_p).astype(jnp.bfloat16)
    w3p = _pad2(w3, h2_p, out_p).astype(jnp.bfloat16)
    b1p = _pad2(b1, 1, h1_p).astype(jnp.float32)
    b2p = _pad2(b2, 1, h2_p).astype(jnp.float32)
    b3p = _pad2(b3, 1, out_p).astype(jnp.float32)

    def const_spec(shape):
        return pl.BlockSpec(shape, lambda i: (0,) * len(shape))

    flops = 2 * B * (d_in * h1_d + h1_d * h2_d + h2_d * d_out)
    bytes_accessed = (xp.size * 2 + w1p.size * 2 + w2p.size * 2 + w3p.size * 2
                      + (b1p.size + b2p.size + b3p.size) * 4 + b_pad * out_p * 4)

    out = pl.pallas_call(
        _mlp_kernel,
        out_shape=jax.ShapeDtypeStruct((b_pad, out_p), jnp.float32),
        grid=(b_pad // tm_eff,),
        in_specs=[
            pl.BlockSpec((tm_eff, d_in), lambda i: (i, 0)),  # x: batch-tiled
            const_spec((d_in, h1_p)),                        # weights/biases:
            const_spec((1, h1_p)),                           #   VMEM-resident
            const_spec((h1_p, h2_p)),                        #   across the grid
            const_spec((1, h2_p)),
            const_spec((h2_p, out_p)),
            const_spec((1, out_p)),
        ],
        out_specs=pl.BlockSpec((tm_eff, out_p), lambda i: (i, 0)),
        compiler_params=pltpu.CompilerParams(
            dimension_semantics=("parallel",),   # shard batch tiles across TCs (v7x)
            vmem_limit_bytes=32 << 20,           # headroom on v7x's 64 MiB VMEM
        ),
        cost_estimate=pl.CostEstimate(
            flops=flops, transcendentals=B * d_out,
            bytes_accessed=bytes_accessed),
    )(xp, w1p, b1p, w2p, b2p, w3p, b3p)

    return out[:B, :d_out]


def init_params(key, input_shape=2560, output_shape=10):
    """Deterministic synthetic init (PyTorch-style uniform fan-in scaling)."""
    dims = [(input_shape, 120), (120, 84), (84, output_shape)]
    names = [("w1", "b1"), ("w2", "b2"), ("w3", "b3")]
    params = {}
    for (fan_in, fan_out), (wn, bn) in zip(dims, names):
        key, kw, kb = jax.random.split(key, 3)
        bound = 1.0 / jnp.sqrt(fan_in)
        params[wn] = jax.random.uniform(kw, (fan_in, fan_out), jnp.float32,
                                        -bound, bound)
        params[bn] = jax.random.uniform(kb, (1, fan_out), jnp.float32,
                                        -bound, bound)
    return params


def reference_forward(x, p):
    """Precision-matched reference: bf16 operands, f32 accumulation."""
    f = lambda a: a.astype(jnp.bfloat16)
    h1 = jnp.maximum(
        jnp.dot(f(x), f(p["w1"]), preferred_element_type=jnp.float32) + p["b1"], 0.0)
    h2 = jnp.maximum(
        jnp.dot(f(h1), f(p["w2"]), preferred_element_type=jnp.float32) + p["b2"], 0.0)
    logits = jnp.dot(f(h2), f(p["w3"]), preferred_element_type=jnp.float32) + p["b3"]
    return jax.nn.sigmoid(logits)


if __name__ == "__main__":
    key = jax.random.PRNGKey(0)
    key, kx = jax.random.split(key)

    B, D_IN, D_OUT = 8, 2560, 10   # small batch; D_in matches the module default
    x = jax.random.normal(kx, (B, D_IN), jnp.float32)
    params = init_params(key, input_shape=D_IN, output_shape=D_OUT)

    out = protein_classifier_forward(x, params)
    out = jax.block_until_ready(out)

    ref = reference_forward(x, params)
    assert out.shape == (B, D_OUT)
    assert jnp.allclose(out, ref, atol=1e-4, rtol=1e-4), "mismatch vs reference"

    print("KERNEL_OK")
</pallas_src>

<mosaic_0001>
module attributes {stable_mosaic.version = 11 : i64} {
  func.func @_mlp_kernel(%arg0: i32, %arg1: memref<8x2560xbf16, #tpu.memory_space<vmem>>, %arg2: memref<2560x128xbf16, #tpu.memory_space<vmem>>, %arg3: memref<1x128xf32, #tpu.memory_space<vmem>>, %arg4: memref<128x128xbf16, #tpu.memory_space<vmem>>, %arg5: memref<1x128xf32, #tpu.memory_space<vmem>>, %arg6: memref<128x128xbf16, #tpu.memory_space<vmem>>, %arg7: memref<1x128xf32, #tpu.memory_space<vmem>>, %arg8: memref<8x128xf32, #tpu.memory_space<vmem>>) attributes {dimension_semantics = [#tpu.dimension_semantics<parallel>], iteration_bounds = array<i64: 1>, scalar_prefetch = 0 : i64, scratch_operands = 0 : i64, tpu.core_type = #tpu.core_type<tc>, window_params = [{transform_indices = @transform_0, window_bounds = array<i64: 8, 2560>}, {pipeline_mode = #tpu.pipeline_mode<synchronous>, transform_indices = @transform_1, window_bounds = array<i64: 2560, 128>}, {pipeline_mode = #tpu.pipeline_mode<synchronous>, transform_indices = @transform_2, window_bounds = array<i64: 1, 128>}, {pipeline_mode = #tpu.pipeline_mode<synchronous>, transform_indices = @transform_3, window_bounds = array<i64: 128, 128>}, {pipeline_mode = #tpu.pipeline_mode<synchronous>, transform_indices = @transform_4, window_bounds = array<i64: 1, 128>}, {pipeline_mode = #tpu.pipeline_mode<synchronous>, transform_indices = @transform_5, window_bounds = array<i64: 128, 128>}, {pipeline_mode = #tpu.pipeline_mode<synchronous>, transform_indices = @transform_6, window_bounds = array<i64: 1, 128>}, {transform_indices = @transform_7, window_bounds = array<i64: 8, 128>}]} {
    %c0 = arith.constant 0 : index
    %c0_0 = arith.constant 0 : index
    %0 = vector.load %arg1[%c0, %c0_0] : memref<8x2560xbf16, #tpu.memory_space<vmem>>, vector<8x2560xbf16>
    %c0_1 = arith.constant 0 : index
    %c0_2 = arith.constant 0 : index
    %1 = vector.load %arg2[%c0_1, %c0_2] : memref<2560x128xbf16, #tpu.memory_space<vmem>>, vector<2560x128xbf16>
    %cst = arith.constant dense<0.000000e+00> : vector<8x128xf32>
    %2 = tpu.matmul %0, %1, %cst {dimension_numbers = #tpu.dot_dimension_numbers<[1], [0], [0], [1], [0, 0, 1, 1], [], []>} : vector<8x2560xbf16>, vector<2560x128xbf16>, vector<8x128xf32> -> vector<8x128xf32>
    %c0_3 = arith.constant 0 : index
    %c0_4 = arith.constant 0 : index
    %3 = vector.load %arg3[%c0_3, %c0_4] : memref<1x128xf32, #tpu.memory_space<vmem>>, vector<1x128xf32>
    %4 = vector.broadcast %3 : vector<1x128xf32> to vector<8x128xf32>
    %5 = arith.addf %2, %4 : vector<8x128xf32>
    %cst_5 = arith.constant 0.000000e+00 : f32
    %6 = vector.broadcast %cst_5 : f32 to vector<8x128xf32>
    %7 = arith.maximumf %5, %6 : vector<8x128xf32>
    %8 = arith.truncf %7 : vector<8x128xf32> to vector<8x128xbf16>
    %c0_6 = arith.constant 0 : index
    %c0_7 = arith.constant 0 : index
    %9 = vector.load %arg4[%c0_6, %c0_7] : memref<128x128xbf16, #tpu.memory_space<vmem>>, vector<128x128xbf16>
    %cst_8 = arith.constant dense<0.000000e+00> : vector<8x128xf32>
    %10 = tpu.matmul %8, %9, %cst_8 {dimension_numbers = #tpu.dot_dimension_numbers<[1], [0], [0], [1], [0, 0, 1, 1], [], []>} : vector<8x128xbf16>, vector<128x128xbf16>, vector<8x128xf32> -> vector<8x128xf32>
    %c0_9 = arith.constant 0 : index
    %c0_10 = arith.constant 0 : index
    %11 = vector.load %arg5[%c0_9, %c0_10] : memref<1x128xf32, #tpu.memory_space<vmem>>, vector<1x128xf32>
    %12 = vector.broadcast %11 : vector<1x128xf32> to vector<8x128xf32>
    %13 = arith.addf %10, %12 : vector<8x128xf32>
    %cst_11 = arith.constant 0.000000e+00 : f32
    %14 = vector.broadcast %cst_11 : f32 to vector<8x128xf32>
    %15 = arith.maximumf %13, %14 : vector<8x128xf32>
    %16 = arith.truncf %15 : vector<8x128xf32> to vector<8x128xbf16>
    %c0_12 = arith.constant 0 : index
    %c0_13 = arith.constant 0 : index
    %17 = vector.load %arg6[%c0_12, %c0_13] : memref<128x128xbf16, #tpu.memory_space<vmem>>, vector<128x128xbf16>
    %cst_14 = arith.constant dense<0.000000e+00> : vector<8x128xf32>
    %18 = tpu.matmul %16, %17, %cst_14 {dimension_numbers = #tpu.dot_dimension_numbers<[1], [0], [0], [1], [0, 0, 1, 1], [], []>} : vector<8x128xbf16>, vector<128x128xbf16>, vector<8x128xf32> -> vector<8x128xf32>
    %c0_15 = arith.constant 0 : index
    %c0_16 = arith.constant 0 : index
    %19 = vector.load %arg7[%c0_15, %c0_16] : memref<1x128xf32, #tpu.memory_space<vmem>>, vector<1x128xf32>
    %20 = vector.broadcast %19 : vector<1x128xf32> to vector<8x128xf32>
    %21 = arith.addf %18, %20 : vector<8x128xf32>
    %22 = arith.negf %21 : vector<8x128xf32>
    %23 = math.exp %22 : vector<8x128xf32>
    %cst_17 = arith.constant 1.000000e+00 : f32
    %24 = vector.broadcast %cst_17 : f32 to vector<8x128xf32>
    %25 = arith.addf %24, %23 : vector<8x128xf32>
    %26 = arith.divf %24, %25 : vector<8x128xf32>
    %c0_18 = arith.constant 0 : index
    %c0_19 = arith.constant 0 : index
    %27 = vector.load %arg8[%c0_18, %c0_19] : memref<8x128xf32, #tpu.memory_space<vmem>>, vector<8x128xf32>
    tpu.vector_store %arg8[%c0_18, %c0_19], %26 {strides = array<i32>} : memref<8x128xf32, #tpu.memory_space<vmem>>, vector<8x128xf32>,
    return
  }
  func.func @transform_0(%arg0: i32) -> (i32, i32) {
    %c0_i32 = arith.constant 0 : i32
    %c0_i32_0 = arith.constant 0 : i32
    return %arg0, %c0_i32 : i32, i32
  }
  func.func @transform_1(%arg0: i32) -> (i32, i32) {
    %c0_i32 = arith.constant 0 : i32
    %c0_i32_0 = arith.constant 0 : i32
    %c0_i32_1 = arith.constant 0 : i32
    return %c0_i32, %c0_i32_0 : i32, i32
  }
  func.func @transform_2(%arg0: i32) -> (i32, i32) {
    %c0_i32 = arith.constant 0 : i32
    %c0_i32_0 = arith.constant 0 : i32
    %c0_i32_1 = arith.constant 0 : i32
    return %c0_i32, %c0_i32_0 : i32, i32
  }
  func.func @transform_3(%arg0: i32) -> (i32, i32) {
    %c0_i32 = arith.constant 0 : i32
    %c0_i32_0 = arith.constant 0 : i32
    %c0_i32_1 = arith.constant 0 : i32
    return %c0_i32, %c0_i32_0 : i32, i32
  }
  func.func @transform_4(%arg0: i32) -> (i32, i32) {
    %c0_i32 = arith.constant 0 : i32
    %c0_i32_0 = arith.constant 0 : i32
    %c0_i32_1 = arith.constant 0 : i32
    return %c0_i32, %c0_i32_0 : i32, i32
  }
  func.func @transform_5(%arg0: i32) -> (i32, i32) {
    %c0_i32 = arith.constant 0 : i32
    %c0_i32_0 = arith.constant 0 : i32
    %c0_i32_1 = arith.constant 0 : i32
    return %c0_i32, %c0_i32_0 : i32, i32
  }
  func.func @transform_6(%arg0: i32) -> (i32, i32) {
    %c0_i32 = arith.constant 0 : i32
    %c0_i32_0 = arith.constant 0 : i32
    %c0_i32_1 = arith.constant 0 : i32
    return %c0_i32, %c0_i32_0 : i32, i32
  }
  func.func @transform_7(%arg0: i32) -> (i32, i32) {
    %c0_i32 = arith.constant 0 : i32
    %c0_i32_0 = arith.constant 0 : i32
    return %arg0, %c0_i32 : i32, i32
  }
}

</mosaic_0001>

<bundles_post_ra>
// kernel: protein_classifier_forward.1
= control target key start
LH: loop header
LB: loop body
LE: loop exit
PB: predicated region body
PF: predicated region fallthrough
CT: control target
= control target key end

     0   :  { %s3379_s0 = inlined_call_operand.vmem [shape: bf16[8,2560], index: 0, kind: input, shape index: {}]   ;;  %s3380_s1 = inlined_call_operand.vmem [shape: bf16[2560,128], index: 1, kind: input, shape index: {}]   ;;  %s3381_s2 = inlined_call_operand.vmem [shape: f32[1,128], index: 2, kind: input, shape index: {}]   ;;  %s3382_s3 = inlined_call_operand.vmem [shape: bf16[128,128], index: 3, kind: input, shape index: {}]   ;;  %s3383_s4 = inlined_call_operand.vmem [shape: f32[1,128], index: 4, kind: input, shape index: {}]   ;;  %s3384_s5 = inlined_call_operand.vmem [shape: bf16[128,128], index: 5, kind: input, shape index: {}]   ;;  %s3385_s6 = inlined_call_operand.vmem [shape: f32[1,128], index: 6, kind: input, shape index: {}]   ;;  %s3386_s7 = inlined_call_operand.hbm [shape: f32[8,128], index: 7, kind: output, shape index: {}]  }
   0x1   :  { %v2565_v0 = vld [vmem:[%s3380_s1 + $0x38] sm:$0xff]  ;;  %v2564_v4 = vld [vmem:[%s3380_s1 + $0x30] sm:$0xff]  ;;  %v2563_v8 = vld [vmem:[%s3380_s1 + $0x28] sm:$0xff] }
   0x2   :  { %v2573_v1 = vld [vmem:[%s3380_s1 + $0x78] sm:$0xff]  ;;  %1391 = vmatpush.bf16.msra.mxu0 %v2565_v0  ;;  %v2572_v5 = vld [vmem:[%s3380_s1 + $0x70] sm:$0xff]  ;;  %v2571_v9 = vld [vmem:[%s3380_s1 + $0x68] sm:$0xff] }
   0x3   :  { %v2581_v2 = vld [vmem:[%s3380_s1 + $0xb8] sm:$0xff]  ;;  %1404 = vmatpush.bf16.msra.mxu1 %v2573_v1  ;;  %v2580_v6 = vld [vmem:[%s3380_s1 + $0xb0] sm:$0xff]  ;;  %v2579_v10 = vld [vmem:[%s3380_s1 + $0xa8] sm:$0xff] }
   0x4   :  { %v2589_v3 = vld [vmem:[%s3380_s1 + $0xf8] sm:$0xff]  ;;  %1417 = vmatpush.bf16.msra.mxu2 %v2581_v2  ;;  %v2588_v7 = vld [vmem:[%s3380_s1 + $0xf0] sm:$0xff]  ;;  %v2587_v11 = vld [vmem:[%s3380_s1 + $0xe8] sm:$0xff] }
   0x5   :  { %1430 = vmatpush.bf16.msra.mxu3 %v2589_v3  ;;  %v2562_v12 = vld [vmem:[%s3380_s1 + $0x20] sm:$0xff]  ;;  %v2561_v16 = vld [vmem:[%s3380_s1 + $0x18] sm:$0xff]  ;;  %v2560_v20 = vld [vmem:[%s3380_s1 + $0x10] sm:$0xff] }
   0x6   :  { %1392 = vmatpush.bf16.msra.mxu0 %v2564_v4  ;;  %v2570_v13 = vld [vmem:[%s3380_s1 + $0x60] sm:$0xff]  ;;  %v2569_v17 = vld [vmem:[%s3380_s1 + $0x58] sm:$0xff]  ;;  %v2568_v21 = vld [vmem:[%s3380_s1 + $0x50] sm:$0xff] }
   0x7   :  { %1405 = vmatpush.bf16.msra.mxu1 %v2572_v5  ;;  %v2578_v14 = vld [vmem:[%s3380_s1 + $0xa0] sm:$0xff]  ;;  %v2577_v18 = vld [vmem:[%s3380_s1 + $0x98] sm:$0xff]  ;;  %v2576_v22 = vld [vmem:[%s3380_s1 + $0x90] sm:$0xff] }
   0x8   :  { %1418 = vmatpush.bf16.msra.mxu2 %v2580_v6  ;;  %v2586_v15 = vld [vmem:[%s3380_s1 + $0xe0] sm:$0xff]  ;;  %v2585_v19 = vld [vmem:[%s3380_s1 + $0xd8] sm:$0xff]  ;;  %v2584_v23 = vld [vmem:[%s3380_s1 + $0xd0] sm:$0xff] }
   0x9   :  { %1431 = vmatpush.bf16.msra.mxu3 %v2588_v7 }
   0xa   :  { %1393 = vmatpush.bf16.msra.mxu0 %v2563_v8 }
   0xb   :  { %1406 = vmatpush.bf16.msra.mxu1 %v2571_v9 }
   0xc   :  { %1419 = vmatpush.bf16.msra.mxu2 %v2579_v10 }
   0xd   :  { %1432 = vmatpush.bf16.msra.mxu3 %v2587_v11 }
   0xe   :  { %1394 = vmatpush.bf16.msra.mxu0 %v2562_v12 }
   0xf   :  { %1407 = vmatpush.bf16.msra.mxu1 %v2570_v13 }
  0x10   :  { %1420 = vmatpush.bf16.msra.mxu2 %v2578_v14 }
  0x11   :  { %1433 = vmatpush.bf16.msra.mxu3 %v2586_v15 }
  0x12   :  { %1395 = vmatpush.bf16.msra.mxu0 %v2561_v16 }
  0x13   :  { %1408 = vmatpush.bf16.msra.mxu1 %v2569_v17 }
  0x14   :  { %1421 = vmatpush.bf16.msra.mxu2 %v2577_v18 }
  0x15   :  { %1434 = vmatpush.bf16.msra.mxu3 %v2585_v19 }
  0x16   :  { %12 = vsyncpa [#allocation3], 0  ;;  %1396 = vmatpush.bf16.msra.mxu0 %v2560_v20  ;;  %v2559_v24 = vld [vmem:[%s3380_s1 + $0x8] sm:$0xff]  ;;  %v27_v29 = vld [vmem:[%s3379_s0] sm:$0xff] }
  0x17   :  { %1409 = vmatpush.bf16.msra.mxu1 %v2568_v21  ;;  %v2567_v25 = vld [vmem:[%s3380_s1 + $0x48] sm:$0xff]  ;;  %v2558_v30 = vld [vmem:[%s3380_s1] sm:$0xff]  ;;  %v371_v33 = vunpack.c.l.b16 %v27_v29  ;;  %v372_v37 = vunpack.c.h.b16 %v27_v29  ;;  %v2597_v38 = vld [vmem:[%s3380_s1 + $0x138] sm:$0xff] }
  0x18   :  { %v2575_v26 = vld [vmem:[%s3380_s1 + $0x88] sm:$0xff]  ;;  %1422 = vmatpush.bf16.msra.mxu2 %v2576_v22  ;;  %v2566_v31 = vld [vmem:[%s3380_s1 + $0x40] sm:$0xff]  ;;  %v2605_v39 = vld [vmem:[%s3380_s1 + $0x178] sm:$0xff] }
  0x19   :  { %1435 = vmatpush.bf16.msra.mxu3 %v2584_v23  ;;  %v2583_v27 = vld [vmem:[%s3380_s1 + $0xc8] sm:$0xff]  ;;  %v2574_v34 = vld [vmem:[%s3380_s1 + $0x80] sm:$0xff]  ;;  %v2613_v40 = vld [vmem:[%s3380_s1 + $0x1b8] sm:$0xff]  ;;  %v391_v43 = vpack.c.b16 %v371_v33, %v371_v33  ;;  %v392_v45 = vpack.c.b16 %v372_v37, %v372_v37 }
  0x1a   :  { %v28_v28 = vld [vmem:[%s3379_s0 + $0x8] sm:$0xff]  ;;  %1397 = vmatpush.bf16.msra.mxu0 %v2559_v24  ;;  %v2582_v35 = vld [vmem:[%s3380_s1 + $0xc0] sm:$0xff]  ;;  %v2621_v41 = vld [vmem:[%s3380_s1 + $0x1f8] sm:$0xff] }
  0x1b   :  { %1410 = vmatpush.bf16.msra.mxu1 %v2567_v25  ;;  %v373_v32 = vunpack.c.l.b16 %v28_v28  ;;  %v374_v36 = vunpack.c.h.b16 %v28_v28  ;;  %v2596_v46 = vld [vmem:[%s3380_s1 + $0x130] sm:$0xff]  ;;  %v2595_v50 = vld [vmem:[%s3380_s1 + $0x128] sm:$0xff]  ;;  %v2594_v54 = vld [vmem:[%s3380_s1 + $0x120] sm:$0xff] }
  0x1c   :  { %1423 = vmatpush.bf16.msra.mxu2 %v2575_v26  ;;  %v2604_v47 = vld [vmem:[%s3380_s1 + $0x170] sm:$0xff]  ;;  %v2603_v51 = vld [vmem:[%s3380_s1 + $0x168] sm:$0xff]  ;;  %v2602_v55 = vld [vmem:[%s3380_s1 + $0x160] sm:$0xff] }
  0x1d   :  { %1436 = vmatpush.bf16.msra.mxu3 %v2583_v27  ;;  %v393_v42 = vpack.c.b16 %v373_v32, %v373_v32  ;;  %v394_v44 = vpack.c.b16 %v374_v36, %v374_v36  ;;  %v2612_v48 = vld [vmem:[%s3380_s1 + $0x1b0] sm:$0xff]  ;;  %v2611_v52 = vld [vmem:[%s3380_s1 + $0x1a8] sm:$0xff]  ;;  %v2610_v56 = vld [vmem:[%s3380_s1 + $0x1a0] sm:$0xff] }
  0x1e   :  { %1398 = vmatpush.bf16.msra.mxu0 %v2558_v30  ;;  %v2620_v49 = vld [vmem:[%s3380_s1 + $0x1f0] sm:$0xff]  ;;  %v2619_v53 = vld [vmem:[%s3380_s1 + $0x1e8] sm:$0xff]  ;;  %v2618_v57 = vld [vmem:[%s3380_s1 + $0x1e0] sm:$0xff] }
  0x1f   :  { %1411 = vmatpush.bf16.msra.mxu1 %v2566_v31  ;;  %v2593_v58 = vld [vmem:[%s3380_s1 + $0x118] sm:$0xff]  ;;  %v2592_v62 = vld [vmem:[%s3380_s1 + $0x110] sm:$0xff]  ;;  %v2591_v2 = vld [vmem:[%s3380_s1 + $0x108] sm:$0xff] }
  0x20   :  { %1424 = vmatpush.bf16.msra.mxu2 %v2574_v34  ;;  %v2601_v59 = vld [vmem:[%s3380_s1 + $0x158] sm:$0xff]  ;;  %v2600_v63 = vld [vmem:[%s3380_s1 + $0x150] sm:$0xff]  ;;  %v2599_v3 = vld [vmem:[%s3380_s1 + $0x148] sm:$0xff] }
  0x21   :  { %1437 = vmatpush.bf16.msra.mxu3 %v2582_v35  ;;  %1399 = vmatmul.bf16.vlgmr.msra.gmra.mxu0 %v391_v43  ;;  %v2609_v60 = vld [vmem:[%s3380_s1 + $0x198] sm:$0xff]  ;;  %v2608_v0 = vld [vmem:[%s3380_s1 + $0x190] sm:$0xff]  ;;  %v2607_v4 = vld [vmem:[%s3380_s1 + $0x188] sm:$0xff] }
  0x22   :  { %1443 = vmatpush.bf16.msrb.mxu0 %v2597_v38  ;;  %1412 = vmatmul.bf16.vlgmr.msra.gmra.mxu1 %v392_v45  ;;  %v2617_v61 = vld [vmem:[%s3380_s1 + $0x1d8] sm:$0xff]  ;;  %v2616_v1 = vld [vmem:[%s3380_s1 + $0x1d0] sm:$0xff]  ;;  %v2615_v5 = vld [vmem:[%s3380_s1 + $0x1c8] sm:$0xff] }
  0x23   :  { %1456 = vmatpush.bf16.msrb.mxu1 %v2605_v39  ;;  %1425 = vmatmul.bf16.vlgmr.msra.gmra.mxu2 %v393_v42  ;;  %v30_v6 = vld [vmem:[%s3379_s0 + $0x18] sm:$0xff]  ;;  %v29_v7 = vld [vmem:[%s3379_s0 + $0x10] sm:$0xff]  ;;  %v2590_v8 = vld [vmem:[%s3380_s1 + $0x100] sm:$0xff] }
  0x24   :  { %1469 = vmatpush.bf16.msrb.mxu2 %v2613_v40  ;;  %1438 = vmatmul.bf16.vlgmr.msra.gmra.mxu3 %v394_v44  ;;  %v2598_v9 = vld [vmem:[%s3380_s1 + $0x140] sm:$0xff]  ;;  %v377_v10 = vunpack.c.l.b16 %v30_v6  ;;  %v375_v11 = vunpack.c.l.b16 %v29_v7  ;;  %v378_v14 = vunpack.c.h.b16 %v30_v6  ;;  %v376_v15 = vunpack.c.h.b16 %v29_v7  ;;  %v2629_v16 = vld [vmem:[%s3380_s1 + $0x238] sm:$0xff]  ;;  %v2628_v24 = vld [vmem:[%s3380_s1 + $0x230] sm:$0xff] }
  0x25   :  { %1482 = vmatpush.bf16.msrb.mxu3 %v2621_v41  ;;  %v2606_v12 = vld [vmem:[%s3380_s1 + $0x180] sm:$0xff]  ;;  %v2637_v17 = vld [vmem:[%s3380_s1 + $0x278] sm:$0xff]  ;;  %v2636_v25 = vld [vmem:[%s3380_s1 + $0x270] sm:$0xff] }
  0x26   :  { %1444 = vmatpush.bf16.msrb.mxu0 %v2596_v46  ;;  %v2614_v13 = vld [vmem:[%s3380_s1 + $0x1c0] sm:$0xff]  ;;  %v2645_v18 = vld [vmem:[%s3380_s1 + $0x2b8] sm:$0xff]  ;;  %v397_v20 = vpack.c.b16 %v377_v10, %v377_v10  ;;  %v395_v21 = vpack.c.b16 %v375_v11, %v375_v11  ;;  %v398_v22 = vpack.c.b16 %v378_v14, %v378_v14  ;;  %v396_v23 = vpack.c.b16 %v376_v15, %v376_v15  ;;  %v2644_v26 = vld [vmem:[%s3380_s1 + $0x2b0] sm:$0xff] }
  0x27   :  { %1457 = vmatpush.bf16.msrb.mxu1 %v2604_v47  ;;  %v2653_v19 = vld [vmem:[%s3380_s1 + $0x2f8] sm:$0xff]  ;;  %v2652_v27 = vld [vmem:[%s3380_s1 + $0x2f0] sm:$0xff]  ;;  %v2627_v28 = vld [vmem:[%s3380_s1 + $0x228] sm:$0xff] }
  0x28   :  { %1470 = vmatpush.bf16.msrb.mxu2 %v2612_v48  ;;  %v2635_v29 = vld [vmem:[%s3380_s1 + $0x268] sm:$0xff]  ;;  %v2626_v32 = vld [vmem:[%s3380_s1 + $0x220] sm:$0xff]  ;;  %v2625_v36 = vld [vmem:[%s3380_s1 + $0x218] sm:$0xff] }
  0x29   :  { %1483 = vmatpush.bf16.msrb.mxu3 %v2620_v49  ;;  %v2643_v30 = vld [vmem:[%s3380_s1 + $0x2a8] sm:$0xff]  ;;  %v2634_v33 = vld [vmem:[%s3380_s1 + $0x260] sm:$0xff]  ;;  %v2633_v37 = vld [vmem:[%s3380_s1 + $0x258] sm:$0xff] }
  0x2a   :  { %1445 = vmatpush.bf16.msrb.mxu0 %v2595_v50  ;;  %v2651_v31 = vld [vmem:[%s3380_s1 + $0x2e8] sm:$0xff]  ;;  %v2642_v34 = vld [vmem:[%s3380_s1 + $0x2a0] sm:$0xff]  ;;  %v2641_v38 = vld [vmem:[%s3380_s1 + $0x298] sm:$0xff] }
  0x2b   :  { %1458 = vmatpush.bf16.msrb.mxu1 %v2603_v51  ;;  %v2650_v35 = vld [vmem:[%s3380_s1 + $0x2e0] sm:$0xff]  ;;  %v2649_v39 = vld [vmem:[%s3380_s1 + $0x2d8] sm:$0xff]  ;;  %v2624_v40 = vld [vmem:[%s3380_s1 + $0x210] sm:$0xff] }
  0x2c   :  { %1471 = vmatpush.bf16.msrb.mxu2 %v2611_v52  ;;  %v2632_v41 = vld [vmem:[%s3380_s1 + $0x250] sm:$0xff]  ;;  %v2623_v44 = vld [vmem:[%s3380_s1 + $0x208] sm:$0xff]  ;;  %v31_v48 = vld [vmem:[%s3379_s0 + $0x20] sm:$0xff] }
  0x2d   :  { %1484 = vmatpush.bf16.msrb.mxu3 %v2619_v53  ;;  %v2640_v42 = vld [vmem:[%s3380_s1 + $0x290] sm:$0xff]  ;;  %v2631_v45 = vld [vmem:[%s3380_s1 + $0x248] sm:$0xff]  ;;  %v2622_v50 = vld [vmem:[%s3380_s1 + $0x200] sm:$0xff]  ;;  %v379_v52 = vunpack.c.l.b16 %v31_v48 }
  0x2e   :  { %1446 = vmatpush.bf16.msrb.mxu0 %v2594_v54  ;;  %v2648_v43 = vld [vmem:[%s3380_s1 + $0x2d0] sm:$0xff]  ;;  %v2639_v46 = vld [vmem:[%s3380_s1 + $0x288] sm:$0xff]  ;;  %v2630_v51 = vld [vmem:[%s3380_s1 + $0x240] sm:$0xff] }
  0x2f   :  { %1459 = vmatpush.bf16.msrb.mxu1 %v2602_v55  ;;  %v2647_v47 = vld [vmem:[%s3380_s1 + $0x2c8] sm:$0xff]  ;;  %v2638_v54 = vld [vmem:[%s3380_s1 + $0x280] sm:$0xff]  ;;  %v2657_v14 = vld [vmem:[%s3380_s1 + $0x318] sm:$0xff] }
  0x30   :  { %1472 = vmatpush.bf16.msrb.mxu2 %v2610_v56  ;;  %v32_v49 = vld [vmem:[%s3379_s0 + $0x28] sm:$0xff]  ;;  %v2646_v55 = vld [vmem:[%s3380_s1 + $0x2c0] sm:$0xff]  ;;  %v380_v56 = vunpack.c.h.b16 %v31_v48  ;;  %v2665_v15 = vld [vmem:[%s3380_s1 + $0x358] sm:$0xff] }
  0x31   :  { %1485 = vmatpush.bf16.msrb.mxu3 %v2618_v57  ;;  %v381_v53 = vunpack.c.l.b16 %v32_v49  ;;  %v382_v57 = vunpack.c.h.b16 %v32_v49  ;;  %v2659_v6 = vld [vmem:[%s3380_s1 + $0x328] sm:$0xff]  ;;  %v2658_v10 = vld [vmem:[%s3380_s1 + $0x320] sm:$0xff] }
  0x32   :  { %1447 = vmatpush.bf16.msrb.mxu0 %v2593_v58  ;;  %v2661_v58 = vld [vmem:[%s3380_s1 + $0x338] sm:$0xff]  ;;  %v2667_v7 = vld [vmem:[%s3380_s1 + $0x368] sm:$0xff]  ;;  %v2666_v11 = vld [vmem:[%s3380_s1 + $0x360] sm:$0xff] }
  0x33   :  { %1460 = vmatpush.bf16.msrb.mxu1 %v2601_v59  ;;  %v2669_v59 = vld [vmem:[%s3380_s1 + $0x378] sm:$0xff]  ;;  %v2691_v48 = vld [vmem:[%s3380_s1 + $0x428] sm:$0xff] }
  0x34   :  { %1473 = vmatpush.bf16.msrb.mxu2 %v2609_v60  ;;  %v2677_v60 = vld [vmem:[%s3380_s1 + $0x3b8] sm:$0xff]  ;;  %v2699_v49 = vld [vmem:[%s3380_s1 + $0x468] sm:$0xff] }
  0x35   :  { %1486 = vmatpush.bf16.msrb.mxu3 %v2617_v61  ;;  %v2685_v61 = vld [vmem:[%s3380_s1 + $0x3f8] sm:$0xff] }
  0x36   :  { %1448 = vmatpush.bf16.msrb.mxu0 %v2592_v62  ;;  %v399_v62 = vpack.c.b16 %v379_v52, %v379_v52  ;;  %v2690_v52 = vld [vmem:[%s3380_s1 + $0x420] sm:$0xff] }
  0x37   :  { %1461 = vmatpush.bf16.msrb.mxu1 %v2600_v63  ;;  %v401_v63 = vpack.c.b16 %v381_v53, %v381_v53  ;;  %v2698_v53 = vld [vmem:[%s3380_s1 + $0x460] sm:$0xff] }
  0x38   :  { %1474 = vmatpush.bf16.msrb.mxu2 %v2608_v0  ;;  %v400_v0 = vpack.c.b16 %v380_v56, %v380_v56  ;;  %v2689_v56 = vld [vmem:[%s3380_s1 + $0x418] sm:$0xff] }
  0x39   :  { %1487 = vmatpush.bf16.msrb.mxu3 %v2616_v1  ;;  %v402_v1 = vpack.c.b16 %v382_v57, %v382_v57  ;;  %v2697_v57 = vld [vmem:[%s3380_s1 + $0x458] sm:$0xff] }
  0x3a   :  { %1449 = vmatpush.bf16.msrb.mxu0 %v2591_v2  ;;  %v2660_v2 = vld [vmem:[%s3380_s1 + $0x330] sm:$0xff] }
  0x3b   :  { %1462 = vmatpush.bf16.msrb.mxu1 %v2599_v3  ;;  %v2668_v3 = vld [vmem:[%s3380_s1 + $0x370] sm:$0xff] }
  0x3c   :  { %1475 = vmatpush.bf16.msrb.mxu2 %v2607_v4  ;;  %v2676_v4 = vld [vmem:[%s3380_s1 + $0x3b0] sm:$0xff] }
  0x3d   :  { %1488 = vmatpush.bf16.msrb.mxu3 %v2615_v5  ;;  %v2684_v5 = vld [vmem:[%s3380_s1 + $0x3f0] sm:$0xff] }
  0x3e   :  { %1450 = vmatpush.bf16.msrb.mxu0 %v2590_v8  ;;  %v2675_v8 = vld [vmem:[%s3380_s1 + $0x3a8] sm:$0xff] }
  0x3f   :  { %1463 = vmatpush.bf16.msrb.mxu1 %v2598_v9  ;;  %v2683_v9 = vld [vmem:[%s3380_s1 + $0x3e8] sm:$0xff] }
  0x40   :  { %1476 = vmatpush.bf16.msrb.mxu2 %v2606_v12  ;;  %v2674_v12 = vld [vmem:[%s3380_s1 + $0x3a0] sm:$0xff] }
  0x41   :  { %1489 = vmatpush.bf16.msrb.mxu3 %v2614_v13  ;;  %1451 = vmatmul.bf16.vlgmr.msrb.gmra.mxu0 %v395_v21  ;;  %v2682_v13 = vld [vmem:[%s3380_s1 + $0x3e0] sm:$0xff]  ;;  %v2680_v21 = vld [vmem:[%s3380_s1 + $0x3d0] sm:$0xff] }
  0x42   :  { %1495 = vmatpush.bf16.msra.mxu0 %v2629_v16  ;;  %1464 = vmatmul.bf16.vlgmr.msrb.gmra.mxu1 %v396_v23  ;;  %v2673_v16 = vld [vmem:[%s3380_s1 + $0x398] sm:$0xff]  ;;  %v2663_v23 = vld [vmem:[%s3380_s1 + $0x348] sm:$0xff] }
  0x43   :  { %1508 = vmatpush.bf16.msra.mxu1 %v2637_v17  ;;  %1477 = vmatmul.bf16.vlgmr.msrb.gmra.mxu2 %v397_v20  ;;  %v2681_v17 = vld [vmem:[%s3380_s1 + $0x3d8] sm:$0xff]  ;;  %v2672_v20 = vld [vmem:[%s3380_s1 + $0x390] sm:$0xff] }
  0x44   :  { %1521 = vmatpush.bf16.msra.mxu2 %v2645_v18  ;;  %1490 = vmatmul.bf16.vlgmr.msrb.gmra.mxu3 %v398_v22  ;;  %v2656_v18 = vld [vmem:[%s3380_s1 + $0x310] sm:$0xff]  ;;  %v2655_v22 = vld [vmem:[%s3380_s1 + $0x308] sm:$0xff] }
  0x45   :  { %1534 = vmatpush.bf16.msra.mxu3 %v2653_v19  ;;  %v2664_v19 = vld [vmem:[%s3380_s1 + $0x350] sm:$0xff] }
  0x46   :  { %1496 = vmatpush.bf16.msra.mxu0 %v2628_v24  ;;  %v2671_v24 = vld [vmem:[%s3380_s1 + $0x388] sm:$0xff] }
  0x47   :  { %1509 = vmatpush.bf16.msra.mxu1 %v2636_v25  ;;  %v2679_v25 = vld [vmem:[%s3380_s1 + $0x3c8] sm:$0xff] }
  0x48   :  { %1522 = vmatpush.bf16.msra.mxu2 %v2644_v26  ;;  %v33_v26 = vld [vmem:[%s3379_s0 + $0x30] sm:$0xff] }
  0x49   :  { %1535 = vmatpush.bf16.msra.mxu3 %v2652_v27  ;;  %v34_v27 = vld [vmem:[%s3379_s0 + $0x38] sm:$0xff] }
  0x4a   :  { %1497 = vmatpush.bf16.msra.mxu0 %v2627_v28  ;;  %v2654_v28 = vld [vmem:[%s3380_s1 + $0x300] sm:$0xff] }
  0x4b   :  { %1510 = vmatpush.bf16.msra.mxu1 %v2635_v29  ;;  %v2662_v29 = vld [vmem:[%s3380_s1 + $0x340] sm:$0xff] }
  0x4c   :  { %1523 = vmatpush.bf16.msra.mxu2 %v2643_v30  ;;  %v383_v30 = vunpack.c.l.b16 %v33_v26 }
  0x4d   :  { %1536 = vmatpush.bf16.msra.mxu3 %v2651_v31  ;;  %v385_v31 = vunpack.c.l.b16 %v34_v27 }
  0x4e   :  { %1498 = vmatpush.bf16.msra.mxu0 %v2626_v32  ;;  %v2670_v32 = vld [vmem:[%s3380_s1 + $0x380] sm:$0xff] }
  0x4f   :  { %1511 = vmatpush.bf16.msra.mxu1 %v2634_v33  ;;  %v2678_v33 = vld [vmem:[%s3380_s1 + $0x3c0] sm:$0xff] }
  0x50   :  { %1524 = vmatpush.bf16.msra.mxu2 %v2642_v34  ;;  %v384_v34 = vunpack.c.h.b16 %v33_v26 }
  0x51   :  { %1537 = vmatpush.bf16.msra.mxu3 %v2650_v35  ;;  %v386_v35 = vunpack.c.h.b16 %v34_v27 }
  0x52   :  { %1499 = vmatpush.bf16.msra.mxu0 %v2625_v36  ;;  %v2693_v36 = vld [vmem:[%s3380_s1 + $0x438] sm:$0xff] }
  0x53   :  { %1512 = vmatpush.bf16.msra.mxu1 %v2633_v37  ;;  %v2701_v37 = vld [vmem:[%s3380_s1 + $0x478] sm:$0xff] }
  0x54   :  { %1525 = vmatpush.bf16.msra.mxu2 %v2641_v38  ;;  %v2709_v38 = vld [vmem:[%s3380_s1 + $0x4b8] sm:$0xff] }
  0x55   :  { %1538 = vmatpush.bf16.msra.mxu3 %v2649_v39  ;;  %v2717_v39 = vld [vmem:[%s3380_s1 + $0x4f8] sm:$0xff] }
  0x56   :  { %1500 = vmatpush.bf16.msra.mxu0 %v2624_v40  ;;  %v403_v40 = vpack.c.b16 %v383_v30, %v383_v30 }
  0x57   :  { %1513 = vmatpush.bf16.msra.mxu1 %v2632_v41  ;;  %v405_v41 = vpack.c.b16 %v385_v31, %v385_v31 }
  0x58   :  { %1526 = vmatpush.bf16.msra.mxu2 %v2640_v42  ;;  %v404_v42 = vpack.c.b16 %v384_v34, %v384_v34 }
  0x59   :  { %1539 = vmatpush.bf16.msra.mxu3 %v2648_v43  ;;  %v406_v43 = vpack.c.b16 %v386_v35, %v386_v35 }
  0x5a   :  { %1501 = vmatpush.bf16.msra.mxu0 %v2623_v44  ;;  %v2692_v44 = vld [vmem:[%s3380_s1 + $0x430] sm:$0xff] }
  0x5b   :  { %1514 = vmatpush.bf16.msra.mxu1 %v2631_v45  ;;  %v2700_v45 = vld [vmem:[%s3380_s1 + $0x470] sm:$0xff] }
  0x5c   :  { %1527 = vmatpush.bf16.msra.mxu2 %v2639_v46  ;;  %v2708_v46 = vld [vmem:[%s3380_s1 + $0x4b0] sm:$0xff] }
  0x5d   :  { %1540 = vmatpush.bf16.msra.mxu3 %v2647_v47  ;;  %v2716_v47 = vld [vmem:[%s3380_s1 + $0x4f0] sm:$0xff] }
  0x5e   :  { %1502 = vmatpush.bf16.msra.mxu0 %v2622_v50  ;;  %v2707_v50 = vld [vmem:[%s3380_s1 + $0x4a8] sm:$0xff] }
  0x5f   :  { %1515 = vmatpush.bf16.msra.mxu1 %v2630_v51  ;;  %v2715_v51 = vld [vmem:[%s3380_s1 + $0x4e8] sm:$0xff] }
  0x60   :  { %1528 = vmatpush.bf16.msra.mxu2 %v2638_v54  ;;  %v2706_v54 = vld [vmem:[%s3380_s1 + $0x4a0] sm:$0xff] }
  0x61   :  { %1541 = vmatpush.bf16.msra.mxu3 %v2646_v55  ;;  %1503 = vmatmul.bf16.vlgmr.msra.gmra.mxu0 %v399_v62  ;;  %v2714_v55 = vld [vmem:[%s3380_s1 + $0x4e0] sm:$0xff]  ;;  %v2704_v62 = vld [vmem:[%s3380_s1 + $0x490] sm:$0xff] }
  0x62   :  { %1547 = vmatpush.bf16.msrb.mxu0 %v2661_v58  ;;  %1516 = vmatmul.bf16.vlgmr.msra.gmra.mxu1 %v400_v0  ;;  %v2705_v58 = vld [vmem:[%s3380_s1 + $0x498] sm:$0xff]  ;;  %v2687_v0 = vld [vmem:[%s3380_s1 + $0x408] sm:$0xff] }
  0x63   :  { %1560 = vmatpush.bf16.msrb.mxu1 %v2669_v59  ;;  %1529 = vmatmul.bf16.vlgmr.msra.gmra.mxu2 %v401_v63  ;;  %v2713_v59 = vld [vmem:[%s3380_s1 + $0x4d8] sm:$0xff]  ;;  %v2712_v63 = vld [vmem:[%s3380_s1 + $0x4d0] sm:$0xff] }
  0x64   :  { %1573 = vmatpush.bf16.msrb.mxu2 %v2677_v60  ;;  %1542 = vmatmul.bf16.vlgmr.msra.gmra.mxu3 %v402_v1  ;;  %v2688_v60 = vld [vmem:[%s3380_s1 + $0x410] sm:$0xff]  ;;  %v2695_v1 = vld [vmem:[%s3380_s1 + $0x448] sm:$0xff] }
  0x65   :  { %1586 = vmatpush.bf16.msrb.mxu3 %v2685_v61  ;;  %v2696_v61 = vld [vmem:[%s3380_s1 + $0x450] sm:$0xff] }
  0x66   :  { %1548 = vmatpush.bf16.msrb.mxu0 %v2660_v2  ;;  %v35_v2 = vld [vmem:[%s3379_s0 + $0x40] sm:$0xff] }
  0x67   :  { %1561 = vmatpush.bf16.msrb.mxu1 %v2668_v3  ;;  %v2703_v3 = vld [vmem:[%s3380_s1 + $0x488] sm:$0xff] }
  0x68   :  { %1574 = vmatpush.bf16.msrb.mxu2 %v2676_v4  ;;  %v2711_v4 = vld [vmem:[%s3380_s1 + $0x4c8] sm:$0xff] }
  0x69   :  { %1587 = vmatpush.bf16.msrb.mxu3 %v2684_v5  ;;  %v36_v5 = vld [vmem:[%s3379_s0 + $0x48] sm:$0xff] }
  0x6a   :  { %1549 = vmatpush.bf16.msrb.mxu0 %v2659_v6  ;;  %v387_v6 = vunpack.c.l.b16 %v35_v2 }
  0x6b   :  { %1562 = vmatpush.bf16.msrb.mxu1 %v2667_v7  ;;  %v388_v7 = vunpack.c.h.b16 %v35_v2 }
  0x6c   :  { %1575 = vmatpush.bf16.msrb.mxu2 %v2675_v8  ;;  %v2686_v8 = vld [vmem:[%s3380_s1 + $0x400] sm:$0xff] }
  0x6d   :  { %1588 = vmatpush.bf16.msrb.mxu3 %v2683_v9  ;;  %v2694_v9 = vld [vmem:[%s3380_s1 + $0x440] sm:$0xff] }
  0x6e   :  { %1550 = vmatpush.bf16.msrb.mxu0 %v2658_v10  ;;  %v389_v10 = vunpack.c.l.b16 %v36_v5 }
  0x6f   :  { %1563 = vmatpush.bf16.msrb.mxu1 %v2666_v11  ;;  %v390_v11 = vunpack.c.h.b16 %v36_v5 }
  0x70   :  { %1576 = vmatpush.bf16.msrb.mxu2 %v2674_v12  ;;  %v2702_v12 = vld [vmem:[%s3380_s1 + $0x480] sm:$0xff] }
  0x71   :  { %1589 = vmatpush.bf16.msrb.mxu3 %v2682_v13  ;;  %v2710_v13 = vld [vmem:[%s3380_s1 + $0x4c0] sm:$0xff] }
  0x72   :  { %1551 = vmatpush.bf16.msrb.mxu0 %v2657_v14  ;;  %v407_v14 = vpack.c.b16 %v387_v6, %v387_v6 }
  0x73   :  { %1564 = vmatpush.bf16.msrb.mxu1 %v2665_v15  ;;  %v408_v15 = vpack.c.b16 %v388_v7, %v388_v7  ;;  %v2732_v7 = vld [vmem:[%s3384_s5 + $0x30] sm:$0xff] }
  0x74   :  { %1577 = vmatpush.bf16.msrb.mxu2 %v2673_v16  ;;  %v409_v16 = vpack.c.b16 %v389_v10, %v389_v10  ;;  %v2731_v10 = vld [vmem:[%s3384_s5 + $0x28] sm:$0xff] }
  0x75   :  { %1590 = vmatpush.bf16.msrb.mxu3 %v2681_v17  ;;  %v410_v17 = vpack.c.b16 %v390_v11, %v390_v11 }
  0x76   :  { %1552 = vmatpush.bf16.msrb.mxu0 %v2656_v18  ;;  %v2735_v18 = vld [vmem:[%s3381_s2] ss:$0 sm:$0xff] }
  0x77   :  { %1565 = vmatpush.bf16.msrb.mxu1 %v2664_v19 }
  0x78   :  { %1578 = vmatpush.bf16.msrb.mxu2 %v2672_v20 }
  0x79   :  { %1591 = vmatpush.bf16.msrb.mxu3 %v2680_v21 }
  0x7a   :  { %1553 = vmatpush.bf16.msrb.mxu0 %v2655_v22 }
  0x7b   :  { %1566 = vmatpush.bf16.msrb.mxu1 %v2663_v23 }
  0x7c   :  { %1579 = vmatpush.bf16.msrb.mxu2 %v2671_v24 }
  0x7d   :  { %1592 = vmatpush.bf16.msrb.mxu3 %v2679_v25 }
  0x7e   :  { %1554 = vmatpush.bf16.msrb.mxu0 %v2654_v28 }
  0x7f   :  { %1567 = vmatpush.bf16.msrb.mxu1 %v2662_v29 }
  0x80   :  { %1580 = vmatpush.bf16.msrb.mxu2 %v2670_v32 }
  0x81   :  { %1593 = vmatpush.bf16.msrb.mxu3 %v2678_v33  ;;  %1555 = vmatmul.bf16.vlgmr.msrb.gmra.mxu0 %v403_v40 }
  0x82   :  { %1599 = vmatpush.bf16.msra.mxu0 %v2693_v36  ;;  %1568 = vmatmul.bf16.vlgmr.msrb.gmra.mxu1 %v404_v42 }
  0x83   :  { %1612 = vmatpush.bf16.msra.mxu1 %v2701_v37  ;;  %1581 = vmatmul.bf16.vlgmr.msrb.gmra.mxu2 %v405_v41 }
  0x84   :  { %1625 = vmatpush.bf16.msra.mxu2 %v2709_v38  ;;  %1594 = vmatmul.bf16.vlgmr.msrb.gmra.mxu3 %v406_v43 }
  0x85   :  { %1638 = vmatpush.bf16.msra.mxu3 %v2717_v39 }
  0x86   :  { %1600 = vmatpush.bf16.msra.mxu0 %v2692_v44 }
  0x87   :  { %1613 = vmatpush.bf16.msra.mxu1 %v2700_v45 }
  0x88   :  { %1626 = vmatpush.bf16.msra.mxu2 %v2708_v46 }
  0x89   :  { %1639 = vmatpush.bf16.msra.mxu3 %v2716_v47  ;;  %v2725_v47 = vld [vmem:[%s3382_s3 + $0x38] sm:$0xff] }
  0x8a   :  { %1601 = vmatpush.bf16.msra.mxu0 %v2691_v48 }
  0x8b   :  { %1614 = vmatpush.bf16.msra.mxu1 %v2699_v49 }
  0x8c   :  { %1627 = vmatpush.bf16.msra.mxu2 %v2707_v50  ;;  %v2724_v50 = vld [vmem:[%s3382_s3 + $0x30] sm:$0xff] }
  0x8d   :  { %1640 = vmatpush.bf16.msra.mxu3 %v2715_v51  ;;  %v2723_v51 = vld [vmem:[%s3382_s3 + $0x28] sm:$0xff] }
  0x8e   :  { %1602 = vmatpush.bf16.msra.mxu0 %v2690_v52 }
  0x8f   :  { %1615 = vmatpush.bf16.msra.mxu1 %v2698_v53 }
  0x90   :  { %1628 = vmatpush.bf16.msra.mxu2 %v2706_v54  ;;  %v2722_v54 = vld [vmem:[%s3382_s3 + $0x20] sm:$0xff] }
  0x91   :  { %1641 = vmatpush.bf16.msra.mxu3 %v2714_v55  ;;  %v2721_v55 = vld [vmem:[%s3382_s3 + $0x18] sm:$0xff] }
  0x92   :  { %1603 = vmatpush.bf16.msra.mxu0 %v2689_v56 }
  0x93   :  { %1616 = vmatpush.bf16.msra.mxu1 %v2697_v57  ;;  %v2720_v57 = vld [vmem:[%s3382_s3 + $0x10] sm:$0xff] }
  0x94   :  { %1629 = vmatpush.bf16.msra.mxu2 %v2705_v58 }
  0x95   :  { %1642 = vmatpush.bf16.msra.mxu3 %v2713_v59  ;;  %v2719_v59 = vld [vmem:[%s3382_s3 + $0x8] sm:$0xff] }
  0x96   :  { %1604 = vmatpush.bf16.msra.mxu0 %v2688_v60 }
  0x97   :  { %1617 = vmatpush.bf16.msra.mxu1 %v2696_v61 }
  0x98   :  { %1630 = vmatpush.bf16.msra.mxu2 %v2704_v62 }
  0x99   :  { %1643 = vmatpush.bf16.msra.mxu3 %v2712_v63 }
  0x9a   :  { %1605 = vmatpush.bf16.msra.mxu0 %v2687_v0  ;;  %v2718_v0 = vld [vmem:[%s3382_s3] sm:$0xff] }
  0x9b   :  { %1618 = vmatpush.bf16.msra.mxu1 %v2695_v1 }
  0x9c   :  { %1631 = vmatpush.bf16.msra.mxu2 %v2703_v3 }
  0x9d   :  { %1644 = vmatpush.bf16.msra.mxu3 %v2711_v4  ;;  %v2733_v4 = vld [vmem:[%s3384_s5 + $0x38] sm:$0xff] }
  0x9e   :  { %1606 = vmatpush.bf16.msra.mxu0 %v2686_v8  ;;  %v1400_v19 = vpop.f32.mrf.mxu0 }
  0x9f   :  { %1619 = vmatpush.bf16.msra.mxu1 %v2694_v9  ;;  %v1401_v20 = vadd.f32 %v2735_v18, %v1400_v19  ;;  %v1413_v21 = vpop.f32.mrf.mxu1  ;;  %v2728_v19 = vld [vmem:[%s3384_s5 + $0x10] sm:$0xff] }
  0xa0   :  { %1632 = vmatpush.bf16.msra.mxu2 %v2702_v12  ;;  %v2730_v12 = vld [vmem:[%s3384_s5 + $0x20] sm:$0xff] }
  0xa1   :  { %1645 = vmatpush.bf16.msra.mxu3 %v2710_v13  ;;  %1607 = vmatmul.bf16.vlgmr.msra.gmra.mxu0 %v407_v14  ;;  %v1414_v22 = vadd.f32 %v1413_v21, %v1401_v20  ;;  %v2729_v14 = vld [vmem:[%s3384_s5 + $0x18] sm:$0xff] }
  0xa2   :  { %1620 = vmatmul.bf16.vlgmr.msra.gmra.mxu1 %v408_v15  ;;  %1721 = vmatpush.bf16.msrb.mxu0 %v2725_v47 }
  0xa3   :  { %1633 = vmatmul.bf16.vlgmr.msra.gmra.mxu2 %v409_v16  ;;  %1804 = vmatpush.bf16.msrb.mxu1 %v2733_v4 }
  0xa4   :  { %1646 = vmatmul.bf16.vlgmr.msra.gmra.mxu3 %v410_v17 }
  0xa6   :  { %v1426_v23 = vpop.f32.mrf.mxu2  ;;  %v1402_v26 = vpop.f32.mrf.mxu0  ;;  %1722 = vmatpush.bf16.msrb.mxu0 %v2724_v50 }
  0xa7   :  { %v1427_v24 = vadd.f32 %v1426_v23, %v1414_v22  ;;  %v1439_v25 = vpop.f32.mrf.mxu3  ;;  %v1415_v28 = vpop.f32.mrf.mxu1  ;;  %1805 = vmatpush.bf16.msrb.mxu1 %v2732_v7 }
  0xa9   :  { %v1440_v27 = vadd.f32 %v1439_v25, %v1427_v24 }
  0xaa   :  { %1723 = vmatpush.bf16.msrb.mxu0 %v2723_v51 }
  0xab   :  { %1806 = vmatpush.bf16.msrb.mxu1 %v2731_v10 }
  0xae   :  { %v1428_v29 = vpop.f32.mrf.mxu2  ;;  %1724 = vmatpush.bf16.msrb.mxu0 %v2722_v54 }
  0xaf   :  { %v1441_v30 = vpop.f32.mrf.mxu3  ;;  %1807 = vmatpush.bf16.msrb.mxu1 %v2730_v12 }
  0xb2   :  { %1725 = vmatpush.bf16.msrb.mxu0 %v2721_v55 }
  0xb3   :  { %1808 = vmatpush.bf16.msrb.mxu1 %v2729_v14 }
  0xb6   :  { %1726 = vmatpush.bf16.msrb.mxu0 %v2720_v57 }
  0xb7   :  { %1809 = vmatpush.bf16.msrb.mxu1 %v2728_v19 }
  0xba   :  { %1727 = vmatpush.bf16.msrb.mxu0 %v2719_v59 }
  0xbe   :  { %v1452_v31 = vpop.f32.mrf.mxu0  ;;  %1728 = vmatpush.bf16.msrb.mxu0 %v2718_v0 }
  0xbf   :  { %v1453_v32 = vadd.f32 %v1452_v31, %v1440_v27  ;;  %v1465_v33 = vpop.f32.mrf.mxu1  ;;  %v2727_v31 = vld [vmem:[%s3384_s5 + $0x8] sm:$0xff] }
  0xc0   :  { %1810 = vmatpush.bf16.msrb.mxu1 %v2727_v31 }
  0xc1   :  { %v1466_v34 = vadd.f32 %v1465_v33, %v1453_v32  ;;  %v2726_v32 = vld [vmem:[%s3384_s5] sm:$0xff] }
  0xc2   :  { %v2736_v33 = vld [vmem:[%s3383_s4] ss:$0 sm:$0xff]  ;;  %s2768_s4 = smov [#allocation2]  }
  0xc3   :  { %s1842_s5 = sshll.u32 %s2768_s4, 4  ;;  %s1843_s5 = int_to_ptr.vmem [resolvable:$true] %s1842_s5 }
  0xc4   :  { %1811 = vmatpush.bf16.msrb.mxu1 %v2726_v32 }
  0xc6   :  { %v1478_v35 = vpop.f32.mrf.mxu2  ;;  %v1454_v38 = vpop.f32.mrf.mxu0 }
  0xc7   :  { %v1479_v36 = vadd.f32 %v1478_v35, %v1466_v34  ;;  %v1491_v37 = vpop.f32.mrf.mxu3  ;;  %v1467_v40 = vpop.f32.mrf.mxu1 }
  0xc9   :  { %v1492_v39 = vadd.f32 %v1491_v37, %v1479_v36 }
  0xce   :  { %v1480_v41 = vpop.f32.mrf.mxu2 }
  0xcf   :  { %v1493_v42 = vpop.f32.mrf.mxu3 }
  0xde   :  { %v1504_v43 = vpop.f32.mrf.mxu0 }
  0xdf   :  { %v1517_v44 = vpop.f32.mrf.mxu1  ;;  %v1505_v61 = vadd.f32 %v1504_v43, %v1492_v39  ;;  %v2737_v39 = vld [vmem:[%s3385_s6] ss:$0 sm:$0xff]  ;;  %s1844_s6 = sshll.u32 %s3386_s7, 4  ;;  %s1845_s6 = int_to_ptr.hbm [resolvable:$true] %s1844_s6 }
  0xe1   :  { %v1518_v2 = vadd.f32 %v1517_v44, %v1505_v61 }
  0xe6   :  { %v1530_v45 = vpop.f32.mrf.mxu2  ;;  %v1506_v48 = vpop.f32.mrf.mxu0 }
  0xe7   :  { %v1543_v46 = vpop.f32.mrf.mxu3  ;;  %v1519_v49 = vpop.f32.mrf.mxu1  ;;  %v1531_v3 = vadd.f32 %v1530_v45, %v1518_v2 }
  0xe9   :  { %v1544_v8 = vadd.f32 %v1543_v46, %v1531_v3 }
  0xee   :  { %v1532_v52 = vpop.f32.mrf.mxu2 }
  0xef   :  { %v1545_v53 = vpop.f32.mrf.mxu3 }
  0xfe   :  { %v1556_v56 = vpop.f32.mrf.mxu0 }
  0xff   :  { %v1569_v58 = vpop.f32.mrf.mxu1  ;;  %v1557_v9 = vadd.f32 %v1556_v56, %v1544_v8 }
 0x101   :  { %v1570_v11 = vadd.f32 %v1569_v58, %v1557_v9 }
 0x106   :  { %v1582_v60 = vpop.f32.mrf.mxu2  ;;  %v1558_v63 = vpop.f32.mrf.mxu0 }
 0x107   :  { %v1595_v62 = vpop.f32.mrf.mxu3  ;;  %v1571_v1 = vpop.f32.mrf.mxu1  ;;  %v1583_v13 = vadd.f32 %v1582_v60, %v1570_v11 }
 0x109   :  { %v1596_v15 = vadd.f32 %v1595_v62, %v1583_v13 }
 0x10e   :  { %v1584_v5 = vpop.f32.mrf.mxu2 }
 0x10f   :  { %v1597_v6 = vpop.f32.mrf.mxu3 }
 0x11e   :  { %v1608_v16 = vpop.f32.mrf.mxu0 }
 0x11f   :  { %v1621_v17 = vpop.f32.mrf.mxu1  ;;  %v1609_v18 = vadd.f32 %v1608_v16, %v1596_v15 }
 0x121   :  { %v1622_v20 = vadd.f32 %v1621_v17, %v1609_v18 }
 0x126   :  { %v1634_v21 = vpop.f32.mrf.mxu2  ;;  %v1610_v24 = vpop.f32.mrf.mxu0 }
 0x127   :  { %v1647_v22 = vpop.f32.mrf.mxu3  ;;  %v1635_v23 = vadd.f32 %v1634_v21, %v1622_v20  ;;  %v1623_v25 = vpop.f32.mrf.mxu1 }
 0x129   :  { %v1648_v26 = vadd.f32 %v1647_v22, %v1635_v23 }
 0x12b   :  { %v1651_v27 = vmax.f32 %v1648_v26, 0.0 }
 0x12d   :  { %v1652_v28 = vpack.c.bf16 %v1651_v27, %v1651_v27 }
 0x12e   :  { %v1636_v29 = vpop.f32.mrf.mxu2 }
 0x12f   :  { %v1649_v30 = vpop.f32.mrf.mxu3  ;;  %1729 = vmatmul.bf16.vlgmr.msrb.gmra.mxu0 %v1652_v28 }
 0x1ac   :  { %v1730_v34 = vpop.f32.mrf.mxu0 }
 0x1ad   :  { %v1731_v35 = vadd.f32 %v2736_v33, %v1730_v34 }
 0x1af   :  { %v1734_v36 = vmax.f32 %v1731_v35, 0.0 }
 0x1b1   :  { %v1735_v37 = vpack.c.bf16 %v1734_v36, %v1734_v36 }
 0x1b3   :  { %1812 = vmatmul.bf16.vlgmr.msrb.gmra.mxu1 %v1735_v37 }
 0x1b4   :  { %v1732_v38 = vpop.f32.mrf.mxu0 }
 0x230   :  { %v1813_v40 = vpop.f32.mrf.mxu1 }
 0x231   :  { %v1814_v41 = vadd.f32 %v2737_v39, %v1813_v40 }
 0x233   :  { %v2557_v42 = vmul.f32 -1.442695, %v1814_v41 }
 0x235   :  { %2738 = vpow2.f32 %v2557_v42 }
 0x238   :  { %v1815_v43 = vpop.f32.mrf.mxu1 }
 0x23b   :  { %v2739_v44 = vpop.eup %2738 }
 0x23c   :  { %v1820_v45 = vadd.f32 1.0, %v2739_v44 }
 0x23e   :  { %2740 = vrcp.f32 %v1820_v45  ;;  %v1832_v49 = vand.u32 2147483648, %v1820_v45  ;;  %v1830_v51 = vand.u32 2147483647, %v1820_v45  ;;  %vm1826_vm1 = vweird.f32 %v1820_v45 }
 0x240   :  { %v1833_v53 = vor.u32 1.1754944e-38, %v1832_v49  ;;  %vm1831_vm3 = vcmp.eq.f32.partialorder %v1830_v51, 8.507059e+37 }
 0x244   :  { %v2741_v46 = vpop.eup %2740 }
 0x245   :  { %v1822_v47 = vmul.f32 %v2741_v46, %v1820_v45  ;;  %vm1827_vm0 = vweird.f32 %v2741_v46 }
 0x246   :  { %vm1828_vm2 = vmor %vm1826_vm1, %vm1827_vm0 }
 0x247   :  { %v1823_v48 = vsub.f32 1.0, %v1822_v47 }
 0x249   :  { %v1824_v50 = vmul.f32 %v2741_v46, %v1823_v48 }
 0x24b   :  { %v1825_v52 = vadd.f32 %v2741_v46, %v1824_v50 }
 0x24d   :  { %v1829_v54 = vsel %vm1828_vm2, %v2741_v46, %v1825_v52 }
 0x24e   :  { %v1834_v55 = vsel %vm1831_vm3, %v1833_v53, %v1829_v54 }
 0x24f   :  { %1836 = vst [vmem:[#allocation2] sm:$0xff] %v1834_v55 }
 0x250   :  { %1847 = dma.vmem_to_hbm [thread:$0]  %s1843_s5, 128, %s1845_s6, [#allocation3]  }
 0x251   :  { %2766 = dma.done.wait [#allocation3], 128  }
 0x252   :  { %2767 = vsyncadd [#allocation3], 4294967168 }
 0x253   :  { %1852 = vsyncpa [#allocation3], 1 }

</bundles_post_ra>
